<compile_context>
chip_gen: v6e
topology: v6e:2x2x1
jax: 0.10.0
libtpu: 0.0.40
codegen_flags: <defaults>
</compile_context>

<pallas_src>
import jax
import jax.numpy as jnp
from jax import lax
from jax.experimental import pallas as pl
from jax.experimental.pallas import tpu as pltpu


_ROW_TILE = 2048     # max rows (output pixels) per grid step, multiple of 8
_K_PACK = 16         # bf16 sublane pack for the contraction dim


def _round_up(x, m):
    return (x + m - 1) // m * m


def _pick_row_tile(M):
    """Pick the row-tile size tm (multiple of 8) and the padded row count Mp.

    Prefers a tm that divides M exactly (row pad elided -> no extra patches
    copy) and leaves at least two grid steps when M is large enough (keeps
    both v7x TensorCores fed on the "parallel" grid axis).  Falls back to
    padding M up to a multiple of tm.
    """
    cap = _ROW_TILE
    if M > 16:  # leave >= 2 grid steps so megacore parts split the work
        cap = min(cap, _round_up((M + 1) // 2, 8))
    if M % 8 == 0:
        best = None
        d = 8
        limit = min(M, cap)
        while d <= limit:
            if M % d == 0:
                best = d
            d += 8
        if best is not None:
            return best, M
    tm = min(cap, _round_up(M, 8))
    return tm, _round_up(M, tm)


# ---------------------------------------------------------------------------
# Pallas kernel: fused  relu( (patches @ W) * bn_scale + bn_bias )
# ---------------------------------------------------------------------------
def _matmul_bn_relu_kernel(p_ref, w_ref, s_ref, b_ref, o_ref):
    # p_ref: (tm, Kp)    bf16 im2col patches tile
    # w_ref: (Kp, Cout)  bf16 conv weight (unscaled)
    # s_ref: (1, Cout)   f32 folded BN scale  (gamma / sqrt(var + eps))
    # b_ref: (1, Cout)   f32 folded BN bias   (beta - mean * scale)
    # o_ref: (tm, Cout)  bf16 output tile
    acc = jnp.dot(p_ref[...], w_ref[...], preferred_element_type=jnp.float32)
    y = jnp.maximum(acc * s_ref[...] + b_ref[...], 0.0)
    o_ref[...] = y.astype(o_ref.dtype)


def conv3x3_bn_relu(x_nhwc, w_oihw, bn_scale, bn_bias, *, stride=2, pad=1):
    """One conv3x3_block: 3x3 conv (stride 2, pad 1, no bias) + BN + ReLU.

    x_nhwc : (N, H, W, Cin) float32 or bfloat16
    w_oihw : (Cout, Cin, 3, 3) float32  (PyTorch conv weight layout)
    bn_scale, bn_bias : (Cout,) folded BatchNorm affine (inference mode)
    Returns (N, Ho, Wo, Cout) bfloat16.
    """
    N, H, W, Cin = x_nhwc.shape
    Cout = w_oihw.shape[0]
    Ho = (H + 2 * pad - 3) // stride + 1
    Wo = (W + 2 * pad - 3) // stride + 1

    M = N * Ho * Wo
    K = 9 * Cin
    Kp = _round_up(K, _K_PACK)          # tiny sublane pack only (NOT 128)
    tm, Mp = _pick_row_tile(M)

    # --- glue: im2col in bf16 (pad + 9 strided views, one concat) ----------
    # Precision note (intentional): activations are bf16 for the MXU path.
    x_bf16 = x_nhwc.astype(jnp.bfloat16)      # no-op for layers 2/3
    xp = jnp.pad(x_bf16, ((0, 0), (pad, pad), (pad, pad), (0, 0)))
    cols = []
    for kh in range(3):
        for kw in range(3):
            cols.append(
                lax.slice(
                    xp,
                    (0, kh, kw, 0),
                    (N, kh + stride * (Ho - 1) + 1, kw + stride * (Wo - 1) + 1, Cin),
                    (1, stride, stride, 1),
                )
            )
    if Kp > K:   # fold the K zero-pad into the single concat (no extra copy)
        cols.append(jnp.zeros((N, Ho, Wo, Kp - K), jnp.bfloat16))
    patches = jnp.concatenate(cols, axis=-1)       # (N, Ho, Wo, Kp)
    P = patches.reshape(M, Kp)                     # contiguous reshape (free)
    if Mp > M:                                     # only when tm does not divide M
        P = jnp.pad(P, ((0, Mp - M), (0, 0)))

    # Weight as (Kp, Cout) bf16; BN scale/bias stay f32 (applied in epilogue).
    w_mat = jnp.transpose(w_oihw, (2, 3, 1, 0)).reshape(K, Cout)
    w_mat = jnp.pad(w_mat, ((0, Kp - K), (0, 0))).astype(jnp.bfloat16)
    scale = bn_scale.reshape(1, Cout).astype(jnp.float32)
    bias = bn_bias.reshape(1, Cout).astype(jnp.float32)

    cost = pl.CostEstimate(
        flops=2 * Mp * Kp * Cout,
        transcendentals=0,
        bytes_accessed=(Mp * Kp + Kp * Cout + Mp * Cout) * 2 + 2 * 4 * Cout,
    )

    out = pl.pallas_call(
        _matmul_bn_relu_kernel,
        grid=(Mp // tm,),
        in_specs=[
            pl.BlockSpec((tm, Kp), lambda i: (i, 0)),
            pl.BlockSpec((Kp, Cout), lambda i: (0, 0)),
            pl.BlockSpec((1, Cout), lambda i: (0, 0)),
            pl.BlockSpec((1, Cout), lambda i: (0, 0)),
        ],
        out_specs=pl.BlockSpec((tm, Cout), lambda i: (i, 0)),
        out_shape=jax.ShapeDtypeStruct((Mp, Cout), jnp.bfloat16),
        compiler_params=pltpu.CompilerParams(
            dimension_semantics=("parallel",),
            vmem_limit_bytes=32 * 1024 * 1024,
        ),
        cost_estimate=cost,
    )(P, w_mat, scale, bias)

    if Mp > M:
        out = out[:M]
    return out.reshape(N, Ho, Wo, Cout)


# ---------------------------------------------------------------------------
# Parameter construction (deterministic, synthetic) and module forward
# ---------------------------------------------------------------------------
def make_conv_block_params(key, cin, cout, eps=1e-5):
    k_w, k_g, k_b, k_m, k_v = jax.random.split(key, 5)
    w = 0.1 * jax.random.normal(k_w, (cout, cin, 3, 3), jnp.float32)
    gamma = 1.0 + 0.1 * jax.random.normal(k_g, (cout,), jnp.float32)
    beta = 0.1 * jax.random.normal(k_b, (cout,), jnp.float32)
    running_mean = 0.1 * jax.random.normal(k_m, (cout,), jnp.float32)
    running_var = 1.0 + jnp.abs(jax.random.normal(k_v, (cout,), jnp.float32))
    # Fold inference-mode BatchNorm into per-channel scale/bias (kept in f32,
    # applied inside the kernel epilogue -- NOT folded into the bf16 weight).
    scale = gamma / jnp.sqrt(running_var + eps)
    bias = beta - running_mean * scale
    return {"w": w, "scale": scale, "bias": bias}


def ic_init_block_init(key, in_channels, out_channels):
    mid = out_channels // 2
    k1, k2, k3 = jax.random.split(key, 3)
    return [
        make_conv_block_params(k1, in_channels, mid),
        make_conv_block_params(k2, mid, mid),
        make_conv_block_params(k3, mid, out_channels),
    ]


@jax.jit
def ic_init_block_forward(x_nchw, params):
    # NCHW -> NHWC for the kernel path.
    x = jnp.transpose(x_nchw, (0, 2, 3, 1))
    for p in params:
        x = conv3x3_bn_relu(x, p["w"], p["scale"], p["bias"], stride=2, pad=1)
    # back to NCHW (PyTorch convention), f32 for downstream consumers
    return jnp.transpose(x, (0, 3, 1, 2)).astype(jnp.float32)


# Pure-JAX reference (lax.conv, f32) for the correctness check.
def _reference_forward(x_nchw, params):
    x = x_nchw
    for p in params:
        y = lax.conv_general_dilated(
            x, p["w"], window_strides=(2, 2), padding=((1, 1), (1, 1)),
            dimension_numbers=("NCHW", "OIHW", "NCHW"))
        y = y * p["scale"][None, :, None, None] + p["bias"][None, :, None, None]
        x = jnp.maximum(y, 0.0)
    return x


if __name__ == "__main__":
    key = jax.random.PRNGKey(0)
    k_x, k_p = jax.random.split(key)

    in_channels, out_channels = 4, 8
    x = jax.random.normal(k_x, (2, in_channels, 16, 16), jnp.float32)  # NCHW

    params = ic_init_block_init(k_p, in_channels, out_channels)

    out = ic_init_block_forward(x, params)
    out = jax.block_until_ready(out)

    assert out.shape == (2, out_channels, 2, 2), out.shape

    ref = _reference_forward(x, params)
    # bf16 activations / weights with f32 accumulation -> loosened tolerance.
    err = float(jnp.max(jnp.abs(out - ref)))
    assert jnp.allclose(out, ref, atol=3e-2, rtol=3e-2), err

    print("KERNEL_OK")
</pallas_src>

<mosaic_0001>
module attributes {stable_mosaic.version = 11 : i64} {
  func.func @_matmul_bn_relu_kernel(%arg0: i32, %arg1: memref<64x48xbf16, #tpu.memory_space<vmem>>, %arg2: memref<48x4xbf16, #tpu.memory_space<vmem>>, %arg3: memref<1x4xf32, #tpu.memory_space<vmem>>, %arg4: memref<1x4xf32, #tpu.memory_space<vmem>>, %arg5: memref<64x4xbf16, #tpu.memory_space<vmem>>) attributes {dimension_semantics = [#tpu.dimension_semantics<parallel>], iteration_bounds = array<i64: 2>, scalar_prefetch = 0 : i64, scratch_operands = 0 : i64, tpu.core_type = #tpu.core_type<tc>, window_params = [{transform_indices = @transform_0, window_bounds = array<i64: 64, 48>}, {pipeline_mode = #tpu.pipeline_mode<synchronous>, transform_indices = @transform_1, window_bounds = array<i64: 48, 4>}, {pipeline_mode = #tpu.pipeline_mode<synchronous>, transform_indices = @transform_2, window_bounds = array<i64: 1, 4>}, {pipeline_mode = #tpu.pipeline_mode<synchronous>, transform_indices = @transform_3, window_bounds = array<i64: 1, 4>}, {transform_indices = @transform_4, window_bounds = array<i64: 64, 4>}]} {
    %c0 = arith.constant 0 : index
    %c0_0 = arith.constant 0 : index
    %0 = vector.load %arg1[%c0, %c0_0] : memref<64x48xbf16, #tpu.memory_space<vmem>>, vector<64x48xbf16>
    %c0_1 = arith.constant 0 : index
    %c0_2 = arith.constant 0 : index
    %1 = vector.load %arg2[%c0_1, %c0_2] : memref<48x4xbf16, #tpu.memory_space<vmem>>, vector<48x4xbf16>
    %cst = arith.constant dense<0.000000e+00> : vector<64x4xf32>
    %2 = tpu.matmul %0, %1, %cst {dimension_numbers = #tpu.dot_dimension_numbers<[1], [0], [0], [1], [0, 0, 1, 1], [], []>} : vector<64x48xbf16>, vector<48x4xbf16>, vector<64x4xf32> -> vector<64x4xf32>
    %c0_3 = arith.constant 0 : index
    %c0_4 = arith.constant 0 : index
    %3 = vector.load %arg3[%c0_3, %c0_4] : memref<1x4xf32, #tpu.memory_space<vmem>>, vector<1x4xf32>
    %4 = vector.broadcast %3 : vector<1x4xf32> to vector<64x4xf32>
    %5 = arith.mulf %2, %4 : vector<64x4xf32>
    %c0_5 = arith.constant 0 : index
    %c0_6 = arith.constant 0 : index
    %6 = vector.load %arg4[%c0_5, %c0_6] : memref<1x4xf32, #tpu.memory_space<vmem>>, vector<1x4xf32>
    %7 = vector.broadcast %6 : vector<1x4xf32> to vector<64x4xf32>
    %8 = arith.addf %5, %7 : vector<64x4xf32>
    %cst_7 = arith.constant 0.000000e+00 : f32
    %9 = vector.broadcast %cst_7 : f32 to vector<64x4xf32>
    %10 = arith.maximumf %8, %9 : vector<64x4xf32>
    %11 = arith.truncf %10 : vector<64x4xf32> to vector<64x4xbf16>
    %c0_8 = arith.constant 0 : index
    %c0_9 = arith.constant 0 : index
    %12 = vector.load %arg5[%c0_8, %c0_9] : memref<64x4xbf16, #tpu.memory_space<vmem>>, vector<64x4xbf16>
    tpu.vector_store %arg5[%c0_8, %c0_9], %11 {strides = array<i32>} : memref<64x4xbf16, #tpu.memory_space<vmem>>, vector<64x4xbf16>,
    return
  }
  func.func @transform_0(%arg0: i32) -> (i32, i32) {
    %c0_i32 = arith.constant 0 : i32
    %c0_i32_0 = arith.constant 0 : i32
    return %arg0, %c0_i32 : i32, i32
  }
  func.func @transform_1(%arg0: i32) -> (i32, i32) {
    %c0_i32 = arith.constant 0 : i32
    %c0_i32_0 = arith.constant 0 : i32
    %c0_i32_1 = arith.constant 0 : i32
    return %c0_i32, %c0_i32_0 : i32, i32
  }
  func.func @transform_2(%arg0: i32) -> (i32, i32) {
    %c0_i32 = arith.constant 0 : i32
    %c0_i32_0 = arith.constant 0 : i32
    %c0_i32_1 = arith.constant 0 : i32
    return %c0_i32, %c0_i32_0 : i32, i32
  }
  func.func @transform_3(%arg0: i32) -> (i32, i32) {
    %c0_i32 = arith.constant 0 : i32
    %c0_i32_0 = arith.constant 0 : i32
    %c0_i32_1 = arith.constant 0 : i32
    return %c0_i32, %c0_i32_0 : i32, i32
  }
  func.func @transform_4(%arg0: i32) -> (i32, i32) {
    %c0_i32 = arith.constant 0 : i32
    %c0_i32_0 = arith.constant 0 : i32
    return %arg0, %c0_i32 : i32, i32
  }
}

module attributes {stable_mosaic.version = 11 : i64} {
  func.func @_matmul_bn_relu_kernel(%arg0: i32, %arg1: memref<16x48xbf16, #tpu.memory_space<vmem>>, %arg2: memref<48x4xbf16, #tpu.memory_space<vmem>>, %arg3: memref<1x4xf32, #tpu.memory_space<vmem>>, %arg4: memref<1x4xf32, #tpu.memory_space<vmem>>, %arg5: memref<16x4xbf16, #tpu.memory_space<vmem>>) attributes {dimension_semantics = [#tpu.dimension_semantics<parallel>], iteration_bounds = array<i64: 2>, scalar_prefetch = 0 : i64, scratch_operands = 0 : i64, tpu.core_type = #tpu.core_type<tc>, window_params = [{transform_indices = @transform_0, window_bounds = array<i64: 16, 48>}, {pipeline_mode = #tpu.pipeline_mode<synchronous>, transform_indices = @transform_1, window_bounds = array<i64: 48, 4>}, {pipeline_mode = #tpu.pipeline_mode<synchronous>, transform_indices = @transform_2, window_bounds = array<i64: 1, 4>}, {pipeline_mode = #tpu.pipeline_mode<synchronous>, transform_indices = @transform_3, window_bounds = array<i64: 1, 4>}, {transform_indices = @transform_4, window_bounds = array<i64: 16, 4>}]} {
    %c0 = arith.constant 0 : index
    %c0_0 = arith.constant 0 : index
    %0 = vector.load %arg1[%c0, %c0_0] : memref<16x48xbf16, #tpu.memory_space<vmem>>, vector<16x48xbf16>
    %c0_1 = arith.constant 0 : index
    %c0_2 = arith.constant 0 : index
    %1 = vector.load %arg2[%c0_1, %c0_2] : memref<48x4xbf16, #tpu.memory_space<vmem>>, vector<48x4xbf16>
    %cst = arith.constant dense<0.000000e+00> : vector<16x4xf32>
    %2 = tpu.matmul %0, %1, %cst {dimension_numbers = #tpu.dot_dimension_numbers<[1], [0], [0], [1], [0, 0, 1, 1], [], []>} : vector<16x48xbf16>, vector<48x4xbf16>, vector<16x4xf32> -> vector<16x4xf32>
    %c0_3 = arith.constant 0 : index
    %c0_4 = arith.constant 0 : index
    %3 = vector.load %arg3[%c0_3, %c0_4] : memref<1x4xf32, #tpu.memory_space<vmem>>, vector<1x4xf32>
    %4 = vector.broadcast %3 : vector<1x4xf32> to vector<16x4xf32>
    %5 = arith.mulf %2, %4 : vector<16x4xf32>
    %c0_5 = arith.constant 0 : index
    %c0_6 = arith.constant 0 : index
    %6 = vector.load %arg4[%c0_5, %c0_6] : memref<1x4xf32, #tpu.memory_space<vmem>>, vector<1x4xf32>
    %7 = vector.broadcast %6 : vector<1x4xf32> to vector<16x4xf32>
    %8 = arith.addf %5, %7 : vector<16x4xf32>
    %cst_7 = arith.constant 0.000000e+00 : f32
    %9 = vector.broadcast %cst_7 : f32 to vector<16x4xf32>
    %10 = arith.maximumf %8, %9 : vector<16x4xf32>
    %11 = arith.truncf %10 : vector<16x4xf32> to vector<16x4xbf16>
    %c0_8 = arith.constant 0 : index
    %c0_9 = arith.constant 0 : index
    %12 = vector.load %arg5[%c0_8, %c0_9] : memref<16x4xbf16, #tpu.memory_space<vmem>>, vector<16x4xbf16>
    tpu.vector_store %arg5[%c0_8, %c0_9], %11 {strides = array<i32>} : memref<16x4xbf16, #tpu.memory_space<vmem>>, vector<16x4xbf16>,
    return
  }
  func.func @transform_0(%arg0: i32) -> (i32, i32) {
    %c0_i32 = arith.constant 0 : i32
    %c0_i32_0 = arith.constant 0 : i32
    return %arg0, %c0_i32 : i32, i32
  }
  func.func @transform_1(%arg0: i32) -> (i32, i32) {
    %c0_i32 = arith.constant 0 : i32
    %c0_i32_0 = arith.constant 0 : i32
    %c0_i32_1 = arith.constant 0 : i32
    return %c0_i32, %c0_i32_0 : i32, i32
  }
  func.func @transform_2(%arg0: i32) -> (i32, i32) {
    %c0_i32 = arith.constant 0 : i32
    %c0_i32_0 = arith.constant 0 : i32
    %c0_i32_1 = arith.constant 0 : i32
    return %c0_i32, %c0_i32_0 : i32, i32
  }
  func.func @transform_3(%arg0: i32) -> (i32, i32) {
    %c0_i32 = arith.constant 0 : i32
    %c0_i32_0 = arith.constant 0 : i32
    %c0_i32_1 = arith.constant 0 : i32
    return %c0_i32, %c0_i32_0 : i32, i32
  }
  func.func @transform_4(%arg0: i32) -> (i32, i32) {
    %c0_i32 = arith.constant 0 : i32
    %c0_i32_0 = arith.constant 0 : i32
    return %arg0, %c0_i32 : i32, i32
  }
}

module attributes {stable_mosaic.version = 11 : i64} {
  func.func @_matmul_bn_relu_kernel(%arg0: i32, %arg1: memref<8x48xbf16, #tpu.memory_space<vmem>>, %arg2: memref<48x8xbf16, #tpu.memory_space<vmem>>, %arg3: memref<1x8xf32, #tpu.memory_space<vmem>>, %arg4: memref<1x8xf32, #tpu.memory_space<vmem>>, %arg5: memref<8x8xbf16, #tpu.memory_space<vmem>>) attributes {dimension_semantics = [#tpu.dimension_semantics<parallel>], iteration_bounds = array<i64: 1>, scalar_prefetch = 0 : i64, scratch_operands = 0 : i64, tpu.core_type = #tpu.core_type<tc>, window_params = [{transform_indices = @transform_0, window_bounds = array<i64: 8, 48>}, {pipeline_mode = #tpu.pipeline_mode<synchronous>, transform_indices = @transform_1, window_bounds = array<i64: 48, 8>}, {pipeline_mode = #tpu.pipeline_mode<synchronous>, transform_indices = @transform_2, window_bounds = array<i64: 1, 8>}, {pipeline_mode = #tpu.pipeline_mode<synchronous>, transform_indices = @transform_3, window_bounds = array<i64: 1, 8>}, {transform_indices = @transform_4, window_bounds = array<i64: 8, 8>}]} {
    %c0 = arith.constant 0 : index
    %c0_0 = arith.constant 0 : index
    %0 = vector.load %arg1[%c0, %c0_0] : memref<8x48xbf16, #tpu.memory_space<vmem>>, vector<8x48xbf16>
    %c0_1 = arith.constant 0 : index
    %c0_2 = arith.constant 0 : index
    %1 = vector.load %arg2[%c0_1, %c0_2] : memref<48x8xbf16, #tpu.memory_space<vmem>>, vector<48x8xbf16>
    %cst = arith.constant dense<0.000000e+00> : vector<8x8xf32>
    %2 = tpu.matmul %0, %1, %cst {dimension_numbers = #tpu.dot_dimension_numbers<[1], [0], [0], [1], [0, 0, 1, 1], [], []>} : vector<8x48xbf16>, vector<48x8xbf16>, vector<8x8xf32> -> vector<8x8xf32>
    %c0_3 = arith.constant 0 : index
    %c0_4 = arith.constant 0 : index
    %3 = vector.load %arg3[%c0_3, %c0_4] : memref<1x8xf32, #tpu.memory_space<vmem>>, vector<1x8xf32>
    %4 = vector.broadcast %3 : vector<1x8xf32> to vector<8x8xf32>
    %5 = arith.mulf %2, %4 : vector<8x8xf32>
    %c0_5 = arith.constant 0 : index
    %c0_6 = arith.constant 0 : index
    %6 = vector.load %arg4[%c0_5, %c0_6] : memref<1x8xf32, #tpu.memory_space<vmem>>, vector<1x8xf32>
    %7 = vector.broadcast %6 : vector<1x8xf32> to vector<8x8xf32>
    %8 = arith.addf %5, %7 : vector<8x8xf32>
    %cst_7 = arith.constant 0.000000e+00 : f32
    %9 = vector.broadcast %cst_7 : f32 to vector<8x8xf32>
    %10 = arith.maximumf %8, %9 : vector<8x8xf32>
    %11 = arith.truncf %10 : vector<8x8xf32> to vector<8x8xbf16>
    %c0_8 = arith.constant 0 : index
    %c0_9 = arith.constant 0 : index
    %12 = vector.load %arg5[%c0_8, %c0_9] : memref<8x8xbf16, #tpu.memory_space<vmem>>, vector<8x8xbf16>
    tpu.vector_store %arg5[%c0_8, %c0_9], %11 {strides = array<i32>} : memref<8x8xbf16, #tpu.memory_space<vmem>>, vector<8x8xbf16>,
    return
  }
  func.func @transform_0(%arg0: i32) -> (i32, i32) {
    %c0_i32 = arith.constant 0 : i32
    %c0_i32_0 = arith.constant 0 : i32
    return %arg0, %c0_i32 : i32, i32
  }
  func.func @transform_1(%arg0: i32) -> (i32, i32) {
    %c0_i32 = arith.constant 0 : i32
    %c0_i32_0 = arith.constant 0 : i32
    %c0_i32_1 = arith.constant 0 : i32
    return %c0_i32, %c0_i32_0 : i32, i32
  }
  func.func @transform_2(%arg0: i32) -> (i32, i32) {
    %c0_i32 = arith.constant 0 : i32
    %c0_i32_0 = arith.constant 0 : i32
    %c0_i32_1 = arith.constant 0 : i32
    return %c0_i32, %c0_i32_0 : i32, i32
  }
  func.func @transform_3(%arg0: i32) -> (i32, i32) {
    %c0_i32 = arith.constant 0 : i32
    %c0_i32_0 = arith.constant 0 : i32
    %c0_i32_1 = arith.constant 0 : i32
    return %c0_i32, %c0_i32_0 : i32, i32
  }
  func.func @transform_4(%arg0: i32) -> (i32, i32) {
    %c0_i32 = arith.constant 0 : i32
    %c0_i32_0 = arith.constant 0 : i32
    return %arg0, %c0_i32 : i32, i32
  }
}

</mosaic_0001>

<bundles_post_ra>
// kernel: ic_init_block_forward.3
= control target key start
LH: loop header
LB: loop body
LE: loop exit
PB: predicated region body
PF: predicated region fallthrough
CT: control target
= control target key end

     0   :  { %s582_s15 = smov 0   ;;  %s639_s0 = inlined_call_operand.vmem [shape: bf16[128,48], index: 0, kind: input, shape index: {}]   ;;  %s640_s1 = inlined_call_operand.vmem [shape: bf16[48,4], index: 1, kind: input, shape index: {}]   ;;  %s641_s2 = inlined_call_operand.vmem [shape: f32[1,4], index: 2, kind: input, shape index: {}]   ;;  %s642_s3 = inlined_call_operand.vmem [shape: f32[1,4], index: 3, kind: input, shape index: {}]   ;;  %s643_s4 = inlined_call_operand.vmem [shape: bf16[128,4], index: 4, kind: output, shape index: {}]  }
   0x1 LB: > { %s467_s16 = sadd.s32 4294967295, %s555_s15   ;;  %p471_p0 = scmp.ge.s32.totalorder %s555_s15, 1  ;;  %s555_s15 = sphi %s582_s15, %s14_s15  }
   0x2   : > { %p163_p1 = scmp.lt.s32.totalorder %s555_s15, 3 }
   0x4   : > { %p164_p2 = pnand %p471_p0, %p163_p1 }
   0x5   : > { %s472_s19 = sshll.u32 (!%p164_p2), %s467_s16, 3 }
   0x6   : > { %167 = sbr.rel (%p164_p2) target bundleno = 233 (0xe9), region = 36  ;;  %p190_p3 = scmp.lt.s32.totalorder (!%p164_p2), %s472_s19, 15 }
   0xb   : > { %v542_v0 = vld [vmem:[%s640_s1 + $0x10] sm:$0xff]   ;;  %v543_v1 = vld [vmem:[%s640_s1 + $0x8] sm:$0xff]   ;;  %s645_s19 = smov (!%p190_p3, %s472_s19), 15  ;;  %v544_v2 = vld [vmem:[%s640_s1] sm:$0xff]   ;;  %vm254_vm0 = vcmask 392192   ;;  %vm402_vm1 = vcmask 27648  }
   0xc   : > { %514 = vmatprep.subr.bf16.mxu0 %v542_v0  ;;  %528 = vmatprep.subr.bf16.mxu1 %v542_v0  ;;  %s473_s24 = sshll.u32 %s645_s19, 2  ;;  %v487_v7 = vld [vmem:[%s641_s2] ss:$0 sm:$0xff] }
   0xd   : > { %515 = vmatpush3.bf16.msra.mxu0 %v542_v0  ;;  %531 = vmatpush3.bf16.msra.mxu1 %v542_v0  ;;  %s193_s27 = scalar_lea.vmem %s639_s0, %s473_s24  ;;  %v488_v9 = vld [vmem:[%s642_s3] ss:$0 sm:$0xff]  ;;  %s618_s8 = scalar_lea.vmem %s643_s4, %s473_s24 }
   0xe   : > { %516 = vmatprep.subr.bf16.mxu0 %v543_v1  ;;  %529 = vmatprep.subr.bf16.mxu1 %v543_v1  ;;  %v545_v3 = vld [vmem:[%s193_s27] sm:$0xff]   ;;  %v546_v4 = vld [vmem:[%s193_s27 + $0x10] sm:$0xff]   ;;  %v547_v5 = vld [vmem:[%s193_s27 + $0x8] sm:$0xff]  }
   0xf   : > { %520 = vmatprep.mubr.msk.bf16.mxu0 %vm254_vm0, %v545_v3  ;;  %524 = vmatprep.mubr.msk.bf16.mxu1 %vm254_vm0, %v546_v4  ;;  %v548_v6 = vld [vmem:[%s193_s27 + $0x18] sm:$0xff]  }
  0x11   : > { %517 = vmatpush3.bf16.msra.mxu0 %v543_v1  ;;  %532 = vmatpush3.bf16.msra.mxu1 %v543_v1 }
  0x12   : > { %518 = vmatprep.subr.bf16.mxu0 %v544_v2  ;;  %530 = vmatprep.subr.bf16.mxu1 %v544_v2 }
  0x15   : > { %519 = vmatpush3.bf16.msra.mxu0 %v544_v2  ;;  %533 = vmatpush3.bf16.msra.mxu1 %v544_v2 }
  0x18   : > { %521 = vmatmul.mubr.msk.bf16.vlgmr.msra.gmra.mxu0 %vm254_vm0, %v547_v5  ;;  %525 = vmatmul.mubr.msk.bf16.vlgmr.msra.gmra.mxu1 %vm254_vm0, %v548_v6 }
  0xd8   : > { %v522_v8 = vpop.f32.mrf.mxu0  ;;  %v526_v10 = vpop.f32.mrf.mxu1 }
  0xd9   : > { %v341_v11 = vmul.f32 %v522_v8, %v487_v7  ;;  %v345_v12 = vmul.f32 %v526_v10, %v487_v7 }
  0xda   : > { %v301_v13 = vpop.f32.mrf.mxu0  ;;  %v317_v14 = vpop.f32.mrf.mxu1 }
  0xdb   : > { %v356_v15 = vadd.f32 %v488_v9, %v341_v11  ;;  %v360_v16 = vadd.f32 %v488_v9, %v345_v12  ;;  %v339_v17 = vmul.f32 %v487_v7, %v301_v13  ;;  %v343_v18 = vmul.f32 %v487_v7, %v317_v14 }
  0xdc   : > { %v523_v19 = vpop.f32.mrf.mxu0  ;;  %v527_v20 = vpop.f32.mrf.mxu1 }
  0xdd   : > { %v364_v21 = vmax.f32 %v356_v15, 0.0  ;;  %v368_v22 = vmax.f32 %v360_v16, 0.0  ;;  %v354_v23 = vadd.f32 %v488_v9, %v339_v17  ;;  %v358_v24 = vadd.f32 %v488_v9, %v343_v18 }
  0xde   : > { %v342_v25 = vmul.f32 %v523_v19, %v487_v7  ;;  %v346_v26 = vmul.f32 %v527_v20, %v487_v7  ;;  %v304_v27 = vpop.f32.mrf.mxu0  ;;  %v320_v28 = vpop.f32.mrf.mxu1 }
  0xdf   : > { %v501_v29 = vpack.c.bf16 %v364_v21, %v364_v21  ;;  %v505_v30 = vpack.c.bf16 %v368_v22, %v368_v22  ;;  %v362_v31 = vmax.f32 %v354_v23, 0.0  ;;  %v366_v32 = vmax.f32 %v358_v24, 0.0 }
  0xe0   : > { %v357_v33 = vadd.f32 %v488_v9, %v342_v25  ;;  %v361_v34 = vadd.f32 %v488_v9, %v346_v26  ;;  %v340_v35 = vmul.f32 %v487_v7, %v304_v27  ;;  %v344_v36 = vmul.f32 %v487_v7, %v320_v28 }
  0xe1   : > { %405 = vst.msk [vmem:[%s618_s8 + $0x8] sm:$0xf] %vm402_vm1, %v501_v29  ;;  %409 = vst.msk [vmem:[%s618_s8 + $0x18] sm:$0xf] %vm402_vm1, %v505_v30  ;;  %v499_v37 = vpack.c.bf16 %v362_v31, %v362_v31  ;;  %v503_v38 = vpack.c.bf16 %v366_v32, %v366_v32 }
  0xe2   : > { %v365_v39 = vmax.f32 %v357_v33, 0.0  ;;  %v369_v40 = vmax.f32 %v361_v34, 0.0  ;;  %v355_v41 = vadd.f32 %v488_v9, %v340_v35  ;;  %v359_v42 = vadd.f32 %v488_v9, %v344_v36 }
  0xe3   : > { %403 = vst.msk [vmem:[%s618_s8] sm:$0xf] %vm402_vm1, %v499_v37  ;;  %407 = vst.msk [vmem:[%s618_s8 + $0x10] sm:$0xf] %vm402_vm1, %v503_v38 }
  0xe4   : > { %v502_v43 = vpack.c.bf16 %v365_v39, %v365_v39  ;;  %v506_v44 = vpack.c.bf16 %v369_v40, %v369_v40  ;;  %v363_v45 = vmax.f32 %v355_v41, 0.0  ;;  %v367_v46 = vmax.f32 %v359_v42, 0.0 }
  0xe6   : > { %406 = vst.msk [vmem:[%s618_s8 + $0xc] sm:$0xf] %vm402_vm1, %v502_v43  ;;  %410 = vst.msk [vmem:[%s618_s8 + $0x1c] sm:$0xf] %vm402_vm1, %v506_v44  ;;  %v500_v47 = vpack.c.bf16 %v363_v45, %v363_v45  ;;  %v504_v48 = vpack.c.bf16 %v367_v46, %v367_v46 }
  0xe8   : > { %404 = vst.msk [vmem:[%s618_s8 + $0x4] sm:$0xf] %vm402_vm1, %v500_v47  ;;  %408 = vst.msk [vmem:[%s618_s8 + $0x14] sm:$0xf] %vm402_vm1, %v504_v48 }
  0xe9 PF: > { %s14_s15 = sadd.s32 1, %s555_s15  }
  0xea   : > { %p11_p4 = scmp.ge.s32.totalorder %s14_s15, 4  }
  0xec   :  { %13 = sbr.rel (!%p11_p4) target bundleno = 1 (0x1), region = 66 }

// kernel: ic_init_block_forward.4
= control target key start
LH: loop header
LB: loop body
LE: loop exit
PB: predicated region body
PF: predicated region fallthrough
CT: control target
= control target key end

     0   :  { %s450_s15 = smov 0   ;;  %s482_s0 = inlined_call_operand.vmem [shape: bf16[32,48], index: 0, kind: input, shape index: {}]   ;;  %s483_s1 = inlined_call_operand.vmem [shape: bf16[48,4], index: 1, kind: input, shape index: {}]   ;;  %s484_s2 = inlined_call_operand.vmem [shape: f32[1,4], index: 2, kind: input, shape index: {}]   ;;  %s485_s3 = inlined_call_operand.vmem [shape: f32[1,4], index: 3, kind: input, shape index: {}]   ;;  %s486_s4 = inlined_call_operand.vmem [shape: bf16[32,4], index: 4, kind: output, shape index: {}]  }
   0x1 LB: > { %s365_s16 = sadd.s32 4294967295, %s421_s15   ;;  %p369_p0 = scmp.ge.s32.totalorder %s421_s15, 1  ;;  %s421_s15 = sphi %s450_s15, %s14_s15  }
   0x2   : > { %p163_p1 = scmp.lt.s32.totalorder %s421_s15, 3 }
   0x4   : > { %p164_p2 = pnand %p369_p0, %p163_p1 }
   0x5   : > { %s370_s21 = sshll.u32 (!%p164_p2), %s365_s16, 1 }
   0x6   : > { %167 = sbr.rel (%p164_p2) target bundleno = 230 (0xe6), region = 36  ;;  %p190_p3 = scmp.lt.s32.totalorder (!%p164_p2), %s370_s21, 3 }
   0xb   : > { %v411_v0 = vld [vmem:[%s483_s1 + $0x10] sm:$0xff]   ;;  %v423_v1 = vmov 0.0   ;;  %v412_v2 = vld [vmem:[%s483_s1 + $0x8] sm:$0xff]   ;;  %vm424_vm0 = vmmov 0   ;;  %s488_s21 = smov (!%p190_p3, %s370_s21), 3  ;;  %v413_v3 = vld [vmem:[%s483_s1] sm:$0xff]  }
   0xc   : > { %391 = vmatprep.subr.bf16.mxu0 %v423_v1  ;;  %397 = vmatprep.mubr.msk.bf16.mxu0 %vm424_vm0, %v423_v1  ;;  %s371_s24 = sshll.u32 %s488_s21, 2  ;;  %vm233_vm1 = vcmask 392192   ;;  %v379_v5 = vld [vmem:[%s484_s2] ss:$0 sm:$0xff]  ;;  %vm306_vm2 = vcmask 27648  }
   0xd   : > { %392 = vmatpush3.bf16.msra.mxu0 %v411_v0  ;;  %s193_s27 = scalar_lea.vmem %s482_s0, %s371_s24  ;;  %v380_v7 = vld [vmem:[%s485_s3] ss:$0 sm:$0xff]  ;;  %s199_s8 = scalar_lea.vmem %s486_s4, %s371_s24 }
   0xe   : > { %393 = vmatprep.subr.bf16.mxu0 %v423_v1  ;;  %v414_v4 = vld [vmem:[%s193_s27] sm:$0xff]  }
  0x11   : > { %394 = vmatpush3.bf16.msra.mxu0 %v412_v2 }
  0x12   : > { %395 = vmatprep.subr.bf16.mxu0 %v423_v1 }
  0x15   : > { %396 = vmatpush3.bf16.msra.mxu0 %v413_v3 }
  0x18   : > { %398 = vmatmul.mubr.msk.bf16.vlgmr.msra.gmra.mxu0 %vm233_vm1, %v414_v4 }
  0xd8   : > { %v271_v6 = vpop.f32.mrf.mxu0 }
  0xd9   : > { %v285_v8 = vmul.f32 %v379_v5, %v271_v6 }
  0xda   : > { %v399_v9 = vpop.f32.mrf.mxu0 }
  0xdb   : > { %v294_v10 = vadd.f32 %v380_v7, %v285_v8 }
  0xdc   : > { %v274_v11 = vpop.f32.mrf.mxu0 }
  0xdd   : > { %v296_v12 = vmax.f32 %v294_v10, 0.0  ;;  %v286_v13 = vmul.f32 %v379_v5, %v274_v11 }
  0xde   : > { %v400_v14 = vpop.f32.mrf.mxu0 }
  0xdf   : > { %v385_v15 = vpack.c.bf16 %v296_v12, %v296_v12  ;;  %v295_v16 = vadd.f32 %v380_v7, %v286_v13 }
  0xe1   : > { %307 = vst.msk [vmem:[%s199_s8] sm:$0xf] %vm306_vm2, %v385_v15  ;;  %v297_v17 = vmax.f32 %v295_v16, 0.0 }
  0xe3   : > { %v386_v18 = vpack.c.bf16 %v297_v17, %v297_v17 }
  0xe5   : > { %308 = vst.msk [vmem:[%s199_s8 + $0x4] sm:$0xf] %vm306_vm2, %v386_v18 }
  0xe6 PF: > { %s14_s15 = sadd.s32 1, %s421_s15  }
  0xe7   : > { %p11_p4 = scmp.ge.s32.totalorder %s14_s15, 4  }
  0xe9   :  { %13 = sbr.rel (!%p11_p4) target bundleno = 1 (0x1), region = 66 }

// kernel: ic_init_block_forward.5
= control target key start
LH: loop header
LB: loop body
LE: loop exit
PB: predicated region body
PF: predicated region fallthrough
CT: control target
= control target key end

     0   :  { %v136_v0 = vmov 0.0   ;;  %vm137_vm0 = vmmov 0   ;;  %vm43_vm1 = vcmask 392192   ;;  %vm105_vm2 = vcmask 60416   ;;  %s184_s1 = inlined_call_operand.vmem [shape: bf16[48,8], index: 1, kind: input, shape index: {}]   ;;  %s185_s0 = inlined_call_operand.vmem [shape: bf16[8,48], index: 0, kind: input, shape index: {}]   ;;  %s186_s2 = inlined_call_operand.vmem [shape: f32[1,8], index: 2, kind: input, shape index: {}]   ;;  %s187_s3 = inlined_call_operand.vmem [shape: f32[1,8], index: 3, kind: input, shape index: {}]   ;;  %s188_s4 = inlined_call_operand.vmem [shape: bf16[8,8], index: 4, kind: output, shape index: {}]  }
   0x1   :  { %121 = vmatprep.subr.bf16.mxu0 %v136_v0  ;;  %v133_v1 = vld [vmem:[%s184_s1 + $0x10] sm:$0xff]   ;;  %127 = vmatprep.mubr.msk.bf16.mxu0 %vm137_vm0, %v136_v0  ;;  %v134_v2 = vld [vmem:[%s184_s1 + $0x8] sm:$0xff]   ;;  %v135_v3 = vld [vmem:[%s184_s1] sm:$0xff]  }
   0x2   :  { %122 = vmatpush3.bf16.msra.mxu0 %v133_v1  ;;  %v18_v4 = vld [vmem:[%s185_s0] sm:$0xf] }
   0x3   :  { %123 = vmatprep.subr.bf16.mxu0 %v136_v0  ;;  %v115_v5 = vld [vmem:[%s186_s2] ss:$0 sm:$0xff] }
   0x4   :  { %v116_v7 = vld [vmem:[%s187_s3] ss:$0 sm:$0xff] }
   0x6   :  { %124 = vmatpush3.bf16.msra.mxu0 %v134_v2 }
   0x7   :  { %125 = vmatprep.subr.bf16.mxu0 %v136_v0 }
   0xa   :  { %126 = vmatpush3.bf16.msra.mxu0 %v135_v3 }
   0xd   :  { %128 = vmatmul.mubr.msk.bf16.vlgmr.msra.gmra.mxu0 %vm43_vm1, %v18_v4 }
  0xcd   :  { %v81_v6 = vpop.f32.mrf.mxu0 }
  0xce   :  { %v94_v8 = vmul.f32 %v115_v5, %v81_v6 }
  0xcf   :  { %v129_v9 = vpop.f32.mrf.mxu0 }
  0xd0   :  { %v102_v10 = vadd.f32 %v116_v7, %v94_v8 }
  0xd1   :  { %v84_v11 = vpop.f32.mrf.mxu0 }
  0xd2   :  { %v103_v12 = vmax.f32 %v102_v10, 0.0 }
  0xd3   :  { %v130_v13 = vpop.f32.mrf.mxu0 }
  0xd4   :  { %v104_v14 = vpack.c.bf16 %v103_v12, %v103_v12 }
  0xd6   :  { %106 = vst.msk [vmem:[%s188_s4] sm:$0xf] %vm105_vm2, %v104_v14 }

</bundles_post_ra>
